<compile_context>
chip_gen: v7x
topology: tpu7x:2x2x1
jax: 0.10.0
libtpu: 0.0.40
codegen_flags: <defaults>
</compile_context>

<pallas_src>
import jax
import jax.numpy as jnp
from jax.experimental import pallas as pl
from jax.experimental.pallas import tpu as pltpu


# ---------------------------------------------------------------------------
# Fused kernel: linear1 + ReLU + linear2 + 0.5*(1+tanh(.)) on one params slab.
# ---------------------------------------------------------------------------
def maneuver_time_head_kernel(emb_ref, p_ref, out_ref):
    # emb_ref: (tile_B, F)
    # p_ref:   (R, 8)  with  rows 0..F-1 = w1 (cols 5..7 zero)
    #                        row  F      = b1 (cols 5..7 zero)
    #                        row  F+1    = w2 (cols 5..7 zero)
    #                        row  F+2    = [b2, 0, ...]
    # out_ref: (tile_B, 1)
    F = emb_ref.shape[1]
    w1 = p_ref[0:F, :]                 # (F, 8)
    b1 = p_ref[F:F + 1, :]             # (1, 8)
    w2 = p_ref[F + 1:F + 2, :]         # (1, 8)
    b2 = p_ref[F + 2:F + 3, 0:1]       # (1, 1)

    # Linear1 (MXU, true-f32) + bias + ReLU (VPU). Padded hidden cols stay 0.
    h = jnp.dot(
        emb_ref[...], w1,
        preferred_element_type=jnp.float32,
        precision=jax.lax.Precision.HIGHEST,
    )
    h = jnp.maximum(h + b1, 0.0)

    # Linear2 as VPU multiply + lane reduction (no second MXU pass).
    # Zero-padded columns of h/w2 contribute exactly 0 to the sum.
    y = jnp.sum(h * w2, axis=-1, keepdims=True) + b2

    out_ref[...] = 0.5 * (1.0 + jnp.tanh(y))          # tanh on the EUP


# ---------------------------------------------------------------------------
# Parameter packing: one padded (R, 8) f32 slab (would be precomputed once in
# a real deployment; cost here is a few tiny XLA scatters).
# ---------------------------------------------------------------------------
def _pack_params(w1, b1, w2, b2, *, width=8):
    F, H = w1.shape                     # (in_features, 5)
    assert H <= width and w2.shape == (H, 1) and b1.shape == (H,)
    rows = ((F + 3 + 7) // 8) * 8       # pad row count to a multiple of 8
    p = jnp.zeros((rows, width), jnp.float32)
    p = p.at[:F, :H].set(w1.astype(jnp.float32))
    p = p.at[F, :H].set(b1.astype(jnp.float32))
    p = p.at[F + 1, :H].set(w2[:, 0].astype(jnp.float32))
    p = p.at[F + 2, 0].set(b2.reshape(()).astype(jnp.float32))
    return p


# ---------------------------------------------------------------------------
# Host wrapper: ManeuverTimeHead.forward(embedding)
# Weights are stored as (in, out), i.e. already transposed vs torch's (out, in).
# ---------------------------------------------------------------------------
def maneuver_time_head(embedding, w1, b1, w2, b2, *, tile_b=2048):
    B, F = embedding.shape
    params = _pack_params(w1, b1, w2, b2)
    R, W = params.shape

    # One block if B is small; otherwise tile B (multiple of 8) and pipeline.
    tile = B if B <= tile_b else tile_b
    grid = (pl.cdiv(B, tile),)

    out = pl.pallas_call(
        maneuver_time_head_kernel,
        out_shape=jax.ShapeDtypeStruct((B, 1), jnp.float32),
        grid=grid,
        in_specs=[
            pl.BlockSpec((tile, F), lambda i: (i, 0)),   # streamed batch tiles
            pl.BlockSpec((R, W), lambda i: (0, 0)),      # params resident in VMEM
        ],
        out_specs=pl.BlockSpec((tile, 1), lambda i: (i, 0)),
        compiler_params=pltpu.CompilerParams(
            dimension_semantics=("parallel",),           # v7x: shard B over 2 TCs
        ),
    )(embedding, params)

    # torch.squeeze removes all size-1 dims: (B, 1) -> (B,)  (scalar if B == 1).
    return jnp.squeeze(out)


# ---------------------------------------------------------------------------
# Pure-JAX reference for verification (true-f32 matmuls, like the fp32 module)
# ---------------------------------------------------------------------------
def reference_forward(embedding, w1, b1, w2, b2):
    h = jnp.maximum(
        jnp.dot(embedding, w1, precision=jax.lax.Precision.HIGHEST) + b1[None, :],
        0.0,
    )
    y = jnp.dot(h, w2, precision=jax.lax.Precision.HIGHEST) + b2[None, :]
    return jnp.squeeze(0.5 * (1.0 + jnp.tanh(y)))


if __name__ == "__main__":
    B, IN_FEATURES, HIDDEN, OUT = 2, 32, 5, 1

    key = jax.random.PRNGKey(0)
    k_e, k_w1, k_b1, k_w2, k_b2, k_e2 = jax.random.split(key, 6)

    embedding = jax.random.normal(k_e, (B, IN_FEATURES), dtype=jnp.float32)
    w1 = jax.random.normal(k_w1, (IN_FEATURES, HIDDEN), dtype=jnp.float32) * 0.2
    b1 = jax.random.normal(k_b1, (HIDDEN,), dtype=jnp.float32) * 0.1
    w2 = jax.random.normal(k_w2, (HIDDEN, OUT), dtype=jnp.float32) * 0.2
    b2 = jax.random.normal(k_b2, (OUT,), dtype=jnp.float32) * 0.1

    fwd = jax.jit(maneuver_time_head)

    # --- small-batch path (single block, no pipelining needed) --------------
    out = fwd(embedding, w1, b1, w2, b2)
    jax.block_until_ready(out)
    out_ref = reference_forward(embedding, w1, b1, w2, b2)
    assert out.shape == (B,), out.shape
    assert jnp.allclose(out, out_ref, atol=1e-5, rtol=1e-5)
    assert bool(jnp.all((out >= 0.0) & (out <= 1.0)))   # 0.5*(1+tanh) range

    # --- large-batch path (grid over B, pipelined, parallel axis) -----------
    B2 = 4096
    embedding2 = jax.random.normal(k_e2, (B2, IN_FEATURES), dtype=jnp.float32)
    out2 = fwd(embedding2, w1, b1, w2, b2)
    jax.block_until_ready(out2)
    out2_ref = reference_forward(embedding2, w1, b1, w2, b2)
    assert out2.shape == (B2,), out2.shape
    assert jnp.allclose(out2, out2_ref, atol=1e-5, rtol=1e-5)

    print("KERNEL_OK")
</pallas_src>

<mosaic_0001>
module attributes {stable_mosaic.version = 11 : i64} {
  func.func @maneuver_time_head_kernel(%arg0: i32, %arg1: memref<2x32xf32, #tpu.memory_space<vmem>>, %arg2: memref<40x8xf32, #tpu.memory_space<vmem>>, %arg3: memref<2x1xf32, #tpu.memory_space<vmem>>) attributes {dimension_semantics = [#tpu.dimension_semantics<parallel>], iteration_bounds = array<i64: 1>, scalar_prefetch = 0 : i64, scratch_operands = 0 : i64, tpu.core_type = #tpu.core_type<tc>, window_params = [{transform_indices = @transform_0, window_bounds = array<i64: 2, 32>}, {pipeline_mode = #tpu.pipeline_mode<synchronous>, transform_indices = @transform_1, window_bounds = array<i64: 40, 8>}, {transform_indices = @transform_2, window_bounds = array<i64: 2, 1>}]} {
    %c0 = arith.constant 0 : index
    %c0_0 = arith.constant 0 : index
    %0 = vector.load %arg2[%c0, %c0_0] : memref<40x8xf32, #tpu.memory_space<vmem>>, vector<32x8xf32>
    %c32 = arith.constant 32 : index
    %c0_1 = arith.constant 0 : index
    %1 = vector.load %arg2[%c32, %c0_1] : memref<40x8xf32, #tpu.memory_space<vmem>>, vector<1x8xf32>
    %c33 = arith.constant 33 : index
    %c0_2 = arith.constant 0 : index
    %2 = vector.load %arg2[%c33, %c0_2] : memref<40x8xf32, #tpu.memory_space<vmem>>, vector<1x8xf32>
    %c34 = arith.constant 34 : index
    %c0_3 = arith.constant 0 : index
    %3 = vector.load %arg2[%c34, %c0_3] : memref<40x8xf32, #tpu.memory_space<vmem>>, vector<1x1xf32>
    %c0_4 = arith.constant 0 : index
    %c0_5 = arith.constant 0 : index
    %4 = vector.load %arg1[%c0_4, %c0_5] : memref<2x32xf32, #tpu.memory_space<vmem>>, vector<2x32xf32>
    %cst = arith.constant dense<0.000000e+00> : vector<2x8xf32>
    %5 = tpu.matmul %4, %0, %cst {dimension_numbers = #tpu.dot_dimension_numbers<[1], [0], [0], [1], [0, 0, 1, 1], [], []>, precision = #tpu.contract_precision<fp32>} : vector<2x32xf32>, vector<32x8xf32>, vector<2x8xf32> -> vector<2x8xf32>
    %6 = vector.broadcast %1 : vector<1x8xf32> to vector<2x8xf32>
    %7 = arith.addf %5, %6 : vector<2x8xf32>
    %cst_6 = arith.constant 0.000000e+00 : f32
    %8 = vector.broadcast %cst_6 : f32 to vector<2x8xf32>
    %9 = arith.maximumf %7, %8 : vector<2x8xf32>
    %10 = vector.broadcast %2 : vector<1x8xf32> to vector<2x8xf32>
    %11 = arith.mulf %9, %10 : vector<2x8xf32>
    %cst_7 = arith.constant dense<0.000000e+00> : vector<2xf32>
    %12 = vector.multi_reduction <add>, %11, %cst_7 [1] : vector<2x8xf32> to vector<2xf32>
    %13 = vector.shape_cast %12 : vector<2xf32> to vector<2x1xf32>
    %14 = vector.broadcast %3 : vector<1x1xf32> to vector<2x1xf32>
    %15 = arith.addf %13, %14 : vector<2x1xf32>
    %16 = math.tanh %15 : vector<2x1xf32>
    %cst_8 = arith.constant 1.000000e+00 : f32
    %17 = vector.broadcast %cst_8 : f32 to vector<2x1xf32>
    %18 = arith.addf %17, %16 : vector<2x1xf32>
    %cst_9 = arith.constant 5.000000e-01 : f32
    %19 = vector.broadcast %cst_9 : f32 to vector<2x1xf32>
    %20 = arith.mulf %19, %18 : vector<2x1xf32>
    %c0_10 = arith.constant 0 : index
    %c0_11 = arith.constant 0 : index
    %21 = vector.load %arg3[%c0_10, %c0_11] : memref<2x1xf32, #tpu.memory_space<vmem>>, vector<2x1xf32>
    tpu.vector_store %arg3[%c0_10, %c0_11], %20 {strides = array<i32>} : memref<2x1xf32, #tpu.memory_space<vmem>>, vector<2x1xf32>,
    return
  }
  func.func @transform_0(%arg0: i32) -> (i32, i32) {
    %c0_i32 = arith.constant 0 : i32
    %c0_i32_0 = arith.constant 0 : i32
    return %arg0, %c0_i32 : i32, i32
  }
  func.func @transform_1(%arg0: i32) -> (i32, i32) {
    %c0_i32 = arith.constant 0 : i32
    %c0_i32_0 = arith.constant 0 : i32
    %c0_i32_1 = arith.constant 0 : i32
    return %c0_i32, %c0_i32_0 : i32, i32
  }
  func.func @transform_2(%arg0: i32) -> (i32, i32) {
    %c0_i32 = arith.constant 0 : i32
    %c0_i32_0 = arith.constant 0 : i32
    return %arg0, %c0_i32 : i32, i32
  }
}

</mosaic_0001>

<bundles_post_ra>
// kernel: maneuver_time_head.1
= control target key start
LH: loop header
LB: loop body
LE: loop exit
PB: predicated region body
PF: predicated region fallthrough
CT: control target
= control target key end

     0   :  { %vm23_vm0 = vcmask 261120   ;;  %v686_v0 = vmov 0.0|0.0   ;;  %vm687_vm1 = vmmov 0   ;;  %v688_v8 = vmov 0.0   ;;  %s750_s1 = inlined_call_operand.vmem [shape: f32[40,8], index: 1, kind: input, shape index: {}]   ;;  %s751_s0 = inlined_call_operand.vmem [shape: f32[2,32], index: 0, kind: input, shape index: {}]   ;;  %s752_s2 = inlined_call_operand.vmem [shape: f32[2,1], index: 2, kind: output, shape index: {}]  }
   0x1   :  { %635 = vmatprep.subr.bf16.mxu1 %v686_v0  ;;  %653 = vmatprep.subr.bf16.mxu0 %v686_v0  ;;  %v11_v1 = vld [vmem:[%s750_s1] sm:$0xff]  ;;  %v12_v2 = vld [vmem:[%s750_s1 + $0x8] sm:$0xff]  ;;  %v13_v3 = vld [vmem:[%s750_s1 + $0x10] sm:$0xff]  ;;  %vm518_vm2 = vcmask 58368   ;;  %vm530_vm3 = vcmask 1024  }
   0x2   :  { %v28_v4 = vand.u32 4294901760, %v11_v1  ;;  %v31_v5 = vand.u32 4294901760, %v12_v2  ;;  %v14_v6 = vld [vmem:[%s750_s1 + $0x18] sm:$0xff]  ;;  %v34_v7 = vand.u32 4294901760, %v13_v3  ;;  %577 = vmatprep.mubr.msk.f32.mxu1 %vm687_vm1, %v688_v8  ;;  %610 = vmatprep.mubr.msk.f32.mxu0 %vm687_vm1, %v688_v8  ;;  %v18_v9 = vld [vmem:[%s751_s0] sm:$0x3] }
   0x3   :  { %v37_v10 = vand.u32 4294901760, %v14_v6  ;;  %v25_v11 = vsel %vm23_vm0, %v18_v9, 0  ;;  %v536_v41 = vld [vmem:[%s750_s1 + $0x20] ss:$0 sm:$0xff]  ;;  %v537_v48 = vld [vmem:[%s750_s1 + $0x21] ss:$0 sm:$0xff] }
   0x4   :  { %v636_v12 = vpack.c.bf16 %v31_v5, %v28_v4  ;;  %v108_v13 = vsub.f32 %v11_v1, %v28_v4  ;;  %v115_v14 = vsub.f32 %v12_v2, %v31_v5  ;;  %v122_v15 = vsub.f32 %v13_v3, %v34_v7  ;;  %v538_v52 = vld [vmem:[%s750_s1 + $0x22] ss:$0 sm:$0xff] }
   0x5   :  { %v129_v16 = vsub.f32 %v14_v6, %v37_v10  ;;  %v96_v17 = vand.u32 4294901760, %v25_v11  ;;  %v639_v18 = vpack.c.bf16 %v37_v10, %v34_v7 }
   0x6   :  { %637 = vmatpush3.bf16.msra.mxu1 %v636_v12  ;;  %655 = vmatpush3.bf16.msra.mxu0 %v636_v12  ;;  %v109_v19 = vand.u32 4294901760, %v108_v13  ;;  %v116_v20 = vand.u32 4294901760, %v115_v14  ;;  %v123_v21 = vand.u32 4294901760, %v122_v15  ;;  %v648_v39 = vpack.c.bf16 %v115_v14, %v108_v13 }
   0x7   :  { %638 = vmatprep.subr.bf16.mxu1 %v686_v0  ;;  %656 = vmatprep.subr.bf16.mxu0 %v686_v0  ;;  %v97_v22 = vsub.f32 %v25_v11, %v96_v17  ;;  %v130_v23 = vand.u32 4294901760, %v129_v16  ;;  %v651_v40 = vpack.c.bf16 %v129_v16, %v122_v15 }
   0x8   :  { %v110_v24 = vsub.f32 %v108_v13, %v109_v19  ;;  %v117_v25 = vsub.f32 %v115_v14, %v116_v20  ;;  %v124_v26 = vsub.f32 %v122_v15, %v123_v21  ;;  %v660_v31 = vpack.c.bf16 %v116_v20, %v109_v19 }
   0x9   :  { %v98_v27 = vand.u32 4294901760, %v97_v22  ;;  %v131_v28 = vsub.f32 %v129_v16, %v130_v23  ;;  %v663_v37 = vpack.c.bf16 %v130_v23, %v123_v21 }
   0xa   :  { %640 = vmatpush3.bf16.msra.mxu1 %v639_v18  ;;  %658 = vmatpush3.bf16.msra.mxu0 %v639_v18  ;;  %v111_v29 = vand.u32 4294901760, %v110_v24  ;;  %v118_v30 = vand.u32 4294901760, %v117_v25  ;;  %v125_v34 = vand.u32 4294901760, %v124_v26 }
   0xb   :  { %v99_v32 = vsub.f32 %v97_v22, %v98_v27  ;;  %641 = vmatprep.subr.bf16.mxu1 %v686_v0  ;;  %659 = vmatprep.subr.bf16.mxu0 %v686_v0  ;;  %v132_v35 = vand.u32 4294901760, %v131_v28 }
   0xc   :  { %v642_v33 = vpack.c.bf16 %v118_v30, %v111_v29 }
   0xd   :  { %v100_v36 = vand.u32 4294901760, %v99_v32  ;;  %611 = vmatmul.mubr.f32.vlgmr.msra.gmra.mrb[0].mxu0 %v98_v27  ;;  %v645_v38 = vpack.c.bf16 %v132_v35, %v125_v34 }
   0xe   :  { %661 = vmatpush3.bf16.msra.mxu0 %v660_v31  ;;  %621 = vmatprep.mubr.msk.f32.mxu0 %vm687_vm1, %v688_v8 }
   0xf   :  { %578 = vmatmul.mubr.f32.vlgmr.msra.gmra.mrb[0].mxu1 %v100_v36  ;;  %662 = vmatprep.subr.bf16.mxu0 %v686_v0 }
  0x10   :  { %643 = vmatpush3.bf16.msra.mxu1 %v642_v33  ;;  %588 = vmatprep.mubr.msk.f32.mxu1 %vm687_vm1, %v688_v8 }
  0x11   :  { %644 = vmatprep.subr.bf16.mxu1 %v686_v0 }
  0x12   :  { %664 = vmatpush3.bf16.msra.mxu0 %v663_v37 }
  0x13   :  { %665 = vmatprep.subr.bf16.mxu0 %v686_v0 }
  0x14   :  { %646 = vmatpush3.bf16.msra.mxu1 %v645_v38 }
  0x15   :  { %647 = vmatprep.subr.bf16.mxu1 %v686_v0  ;;  %622 = vmatmul.mubr.f32.vlgmr.msra.gmra.mrb[0].mxu0 %v96_v17 }
  0x16   :  { %667 = vmatpush3.bf16.msra.mxu0 %v636_v12  ;;  %632 = vmatprep.mubr.msk.f32.mxu0 %vm687_vm1, %v688_v8 }
  0x17   :  { %589 = vmatmul.mubr.f32.vlgmr.msra.gmra.mrb[0].mxu1 %v96_v17  ;;  %668 = vmatprep.subr.bf16.mxu0 %v686_v0 }
  0x18   :  { %649 = vmatpush3.bf16.msra.mxu1 %v648_v39  ;;  %599 = vmatprep.mubr.msk.f32.mxu1 %vm687_vm1, %v688_v8 }
  0x19   :  { %650 = vmatprep.subr.bf16.mxu1 %v686_v0 }
  0x1a   :  { %670 = vmatpush3.bf16.msra.mxu0 %v639_v18 }
  0x1c   :  { %652 = vmatpush3.bf16.msra.mxu1 %v651_v40 }
  0x1d   :  { %633 = vmatmul.mubr.f32.vlgmr.msra.gmra.mrb[0].mxu0 %v96_v17 }
  0x1f   :  { %600 = vmatmul.mubr.f32.vlgmr.msra.gmra.mrb[0].mxu1 %v97_v22 }
  0xf0   :  { %v508_v42 = vpop.f32.mrb[0].mxu0 }
  0xf1   :  { %v634_v43 = vpop.f32.mrb[1].mxu0 }
  0xf2   :  { %v273_v44 = vpop.f32.mrb[0].mxu1 }
  0xf3   :  { %v671_v45 = vadd.f32 %v536_v41, %v273_v44  ;;  %v601_v46 = vpop.f32.mrb[1].mxu1 }
  0xf5   :  { %v672_v47 = vadd.f32 %v671_v45, %v508_v42 }
  0xf7   :  { %v512_v49 = vmax.f32 %v672_v47, 0.0 }
  0xf9   :  { %v517_v50 = vmul.f32 %v537_v48, %v512_v49 }
  0xfb   :  { %v519_v51 = vsel %vm518_vm2, %v517_v50, 0.0 }
  0xfc   :  { %520 = vadd.xlane.f32.xlu0 %v519_v51 }
 0x189   :  { %v521_v53 = vpop.xlane.xlu0 %520 }
 0x18a   :  { %v526_v54 = vadd.f32 %v538_v52, %v521_v53 }
 0x18c   :  { %684 = vtanh.f32 %v526_v54 }
 0x196   :  { %v685_v55 = vpop.eup %684 }
 0x197   :  { %v528_v56 = vadd.f32 1.0, %v685_v55 }
 0x199   :  { %v529_v57 = vmul.f32 0.5, %v528_v56 }
 0x19b   :  { %531 = vst.msk [vmem:[%s752_s2] sm:$0x3] %vm530_vm3, %v529_v57 }

</bundles_post_ra>
